<compile_context>
chip_gen: v5e
topology: v5e:2x2
jax: 0.10.0
libtpu: 0.0.40
codegen_flags: <defaults>
</compile_context>

<pallas_src>
import jax
import jax.numpy as jnp
from jax.experimental import pallas as pl
from jax.experimental.pallas import tpu as pltpu


def _round_up(x, m):
    return ((x + m - 1) // m) * m


# ---------------- W-resident kernel (small/medium dim) ----------------

def _resident_matmul_kernel(x_ref, w_ref, o_ref):
    # z_tile = x_tile @ W.  W lives fully in VMEM (constant index_map), so it
    # is not re-DMA'd between grid steps.  Single dot, single store, cast at
    # the store so only out-dtype bytes hit HBM.
    o_ref[...] = jnp.dot(
        x_ref[...], w_ref[...], preferred_element_type=jnp.float32
    ).astype(o_ref.dtype)


def _matmul_w_resident(x2, w, M, K, N, N_pad, out_dtype):
    # Row-tile selection: stream M in big tiles to amortize per-step overhead,
    # but keep >= 2 grid steps when M allows so both v7x TensorCores get work.
    target_tm = 512
    if M >= 2 * target_tm:
        tm = target_tm
    else:
        tm = min(target_tm, max(8, _round_up((M + 1) // 2, 8)))
    M_pad = _round_up(M, tm)

    if M_pad != M:
        x2 = jnp.pad(x2, ((0, M_pad - M), (0, 0)))      # pad rows only, never K
    w_p = jnp.pad(w, ((0, 0), (0, N_pad - N))) if N_pad != N else w

    in_itemsize = jnp.dtype(x2.dtype).itemsize
    out_itemsize = jnp.dtype(out_dtype).itemsize
    vmem_bytes = (2 * tm * K * in_itemsize          # double-buffered x tiles
                  + 2 * K * N_pad * in_itemsize     # resident W (2 buffers)
                  + 2 * tm * N_pad * out_itemsize)  # double-buffered out tiles
    vmem_bytes = int(min(max(vmem_bytes + (4 << 20), 16 << 20), 48 << 20))

    z_p = pl.pallas_call(
        _resident_matmul_kernel,
        out_shape=jax.ShapeDtypeStruct((M_pad, N_pad), out_dtype),
        grid_spec=pltpu.PrefetchScalarGridSpec(
            num_scalar_prefetch=0,
            grid=(M_pad // tm,),
            in_specs=[
                pl.BlockSpec((tm, K), lambda i: (i, 0)),     # x: stream rows
                pl.BlockSpec((K, N_pad), lambda i: (0, 0)),  # W: VMEM-resident
            ],
            out_specs=pl.BlockSpec((tm, N_pad), lambda i: (i, 0)),
        ),
        compiler_params=pltpu.CompilerParams(
            dimension_semantics=("parallel",),
            vmem_limit_bytes=vmem_bytes),
    )(x2, w_p)

    if M_pad != M or N_pad != N:
        z_p = z_p[:M, :N]
    return z_p


# ---------------- Tiled (M, N, K) fallback for very large dim ----------------

def _tiled_matmul_kernel(x_ref, w_ref, o_ref, acc_ref):
    @pl.when(pl.program_id(2) == 0)
    def _():
        acc_ref[...] = jnp.zeros_like(acc_ref)

    acc_ref[...] += jnp.dot(x_ref[...], w_ref[...],
                            preferred_element_type=jnp.float32)

    @pl.when(pl.program_id(2) == pl.num_programs(2) - 1)
    def _():
        o_ref[...] = acc_ref[...].astype(o_ref.dtype)


def _matmul_tiled(x2, w, M, K, N, out_dtype):
    tm, tn, tk = 512, 512, 512
    tm = min(tm, max(8, _round_up(M, 8)))
    M_pad = _round_up(M, tm)
    K_pad = _round_up(K, tk)
    N_pad = _round_up(N, tn)

    x_p = jnp.pad(x2, ((0, M_pad - M), (0, K_pad - K)))
    w_p = jnp.pad(w, ((0, K_pad - K), (0, N_pad - N)))

    z_p = pl.pallas_call(
        _tiled_matmul_kernel,
        out_shape=jax.ShapeDtypeStruct((M_pad, N_pad), out_dtype),
        grid_spec=pltpu.PrefetchScalarGridSpec(
            num_scalar_prefetch=0,
            grid=(M_pad // tm, N_pad // tn, K_pad // tk),
            in_specs=[pl.BlockSpec((tm, tk), lambda i, j, k: (i, k)),
                      pl.BlockSpec((tk, tn), lambda i, j, k: (k, j))],
            out_specs=pl.BlockSpec((tm, tn), lambda i, j, k: (i, j)),
            scratch_shapes=[pltpu.VMEM((tm, tn), jnp.float32)],
        ),
        compiler_params=pltpu.CompilerParams(
            dimension_semantics=("parallel", "parallel", "arbitrary"),
            vmem_limit_bytes=int(48 << 20)),
    )(x_p, w_p)

    return z_p[:M, :N]


def _matmul(x2, w, *, out_dtype, mxu_dtype=None):
    """x2: [M, K] @ w: [K, N] -> [M, N] (out_dtype)."""
    M, K = x2.shape
    K2, N = w.shape
    assert K == K2

    if mxu_dtype is not None:
        # bf16-at-MXU is valid on v5e/v6e/v7x (f32 accumulation in-kernel).
        x2 = x2.astype(mxu_dtype)
        w = w.astype(mxu_dtype)

    N_pad = _round_up(N, 128)
    itemsize = jnp.dtype(x2.dtype).itemsize
    if 2 * K * N_pad * itemsize <= (16 << 20):   # W (double-buffered) fits VMEM
        return _matmul_w_resident(x2, w, M, K, N, N_pad, out_dtype)
    return _matmul_tiled(x2, w, M, K, N, out_dtype)


def inv_linear_forward(x, weights, *, mxu_dtype=None):
    """InvLinear.forward.

    x: [B, dim] or [B, T, dim]; weights: [dim, dim].
    Returns (z with x's shape and dtype, logdet of shape [B]).
    """
    x_shape = x.shape
    dim = weights.shape[0]
    if x.ndim == 2:
        x2 = x
        seq_mult = 1.0
    else:
        B, T, _ = x_shape
        x2 = x.reshape(B * T, dim)
        seq_mult = float(T)

    z2 = _matmul(x2, weights, out_dtype=x.dtype, mxu_dtype=mxu_dtype)
    z = z2.reshape(x_shape)

    # TODO(synk): slogdet (LU with pivoting) has no clean Pallas equivalent; it
    # is a parameter-only scalar, computed once in plain JAX and broadcast per
    # batch (times seq-len for 3-D inputs) exactly as the PyTorch module does.
    logdet_scalar = jnp.linalg.slogdet(weights)[1].astype(jnp.float32)
    logdet = jnp.full((x_shape[0],), logdet_scalar * seq_mult, jnp.float32)
    return z, logdet


def reference_forward(x, weights):
    """Pure-JAX reference mirroring the PyTorch forward."""
    z = jnp.einsum("...d,de->...e", x, weights,
                   preferred_element_type=jnp.float32).astype(x.dtype)
    logdet_scalar = jnp.linalg.slogdet(weights)[1].astype(jnp.float32)
    mult = float(x.shape[1]) if x.ndim == 3 else 1.0
    logdet = jnp.full((x.shape[0],), logdet_scalar * mult, jnp.float32)
    return z, logdet


if __name__ == "__main__":
    DIM = 32

    key = jax.random.PRNGKey(0)
    kw, k3, k2 = jax.random.split(key, 3)

    # Orthonormal init via QR, as in the PyTorch module.
    w0 = jax.random.normal(kw, (DIM, DIM), dtype=jnp.float32)
    weights = jnp.linalg.qr(w0)[0].astype(jnp.float32)

    # ---- 3-D input path: x [B, T, dim] ----
    x3 = jax.random.normal(k3, (2, 8, DIM), dtype=jnp.float32)
    z3, ld3 = inv_linear_forward(x3, weights)
    jax.block_until_ready((z3, ld3))
    z3_ref, ld3_ref = reference_forward(x3, weights)
    assert z3.shape == x3.shape and ld3.shape == (x3.shape[0],)
    assert jnp.allclose(z3, z3_ref, atol=1e-4, rtol=1e-4), "z (3D) mismatch"
    assert jnp.allclose(ld3, ld3_ref, atol=1e-5), "logdet (3D) mismatch"

    # ---- 2-D input path: x [B, dim] ----
    x2 = jax.random.normal(k2, (4, DIM), dtype=jnp.float32)
    z2, ld2 = inv_linear_forward(x2, weights)
    jax.block_until_ready((z2, ld2))
    z2_ref, ld2_ref = reference_forward(x2, weights)
    assert z2.shape == x2.shape and ld2.shape == (x2.shape[0],)
    assert jnp.allclose(z2, z2_ref, atol=1e-4, rtol=1e-4), "z (2D) mismatch"
    assert jnp.allclose(ld2, ld2_ref, atol=1e-5), "logdet (2D) mismatch"

    print("KERNEL_OK")
</pallas_src>

<mosaic_0001>
module attributes {stable_mosaic.version = 11 : i64} {
  func.func @_resident_matmul_kernel(%arg0: i32, %arg1: memref<8x32xf32, #tpu.memory_space<vmem>>, %arg2: memref<32x128xf32, #tpu.memory_space<vmem>>, %arg3: memref<8x128xf32, #tpu.memory_space<vmem>>) attributes {dimension_semantics = [#tpu.dimension_semantics<parallel>], iteration_bounds = array<i64: 2>, scalar_prefetch = 0 : i64, scratch_operands = 0 : i64, tpu.core_type = #tpu.core_type<tc>, window_params = [{transform_indices = @transform_0, window_bounds = array<i64: 8, 32>}, {pipeline_mode = #tpu.pipeline_mode<synchronous>, transform_indices = @transform_1, window_bounds = array<i64: 32, 128>}, {transform_indices = @transform_2, window_bounds = array<i64: 8, 128>}]} {
    %c0 = arith.constant 0 : index
    %c0_0 = arith.constant 0 : index
    %0 = vector.load %arg1[%c0, %c0_0] : memref<8x32xf32, #tpu.memory_space<vmem>>, vector<8x32xf32>
    %c0_1 = arith.constant 0 : index
    %c0_2 = arith.constant 0 : index
    %1 = vector.load %arg2[%c0_1, %c0_2] : memref<32x128xf32, #tpu.memory_space<vmem>>, vector<32x128xf32>
    %cst = arith.constant dense<0.000000e+00> : vector<8x128xf32>
    %2 = tpu.matmul %0, %1, %cst {dimension_numbers = #tpu.dot_dimension_numbers<[1], [0], [0], [1], [0, 0, 1, 1], [], []>} : vector<8x32xf32>, vector<32x128xf32>, vector<8x128xf32> -> vector<8x128xf32>
    %c0_3 = arith.constant 0 : index
    %c0_4 = arith.constant 0 : index
    %3 = vector.load %arg3[%c0_3, %c0_4] : memref<8x128xf32, #tpu.memory_space<vmem>>, vector<8x128xf32>
    tpu.vector_store %arg3[%c0_3, %c0_4], %2 {strides = array<i32>} : memref<8x128xf32, #tpu.memory_space<vmem>>, vector<8x128xf32>,
    return
  }
  func.func @transform_0(%arg0: i32) -> (i32, i32) {
    %c0_i32 = arith.constant 0 : i32
    %c0_i32_0 = arith.constant 0 : i32
    return %arg0, %c0_i32 : i32, i32
  }
  func.func @transform_1(%arg0: i32) -> (i32, i32) {
    %c0_i32 = arith.constant 0 : i32
    %c0_i32_0 = arith.constant 0 : i32
    %c0_i32_1 = arith.constant 0 : i32
    return %c0_i32, %c0_i32_0 : i32, i32
  }
  func.func @transform_2(%arg0: i32) -> (i32, i32) {
    %c0_i32 = arith.constant 0 : i32
    %c0_i32_0 = arith.constant 0 : i32
    return %arg0, %c0_i32 : i32, i32
  }
}

</mosaic_0001>

<bundles_post_ra>
// kernel: tpu_custom_call.1
= control target key start
LH: loop header
LB: loop body
LE: loop exit
PB: predicated region body
PF: predicated region fallthrough
CT: control target
= control target key end

     0   :  { %7 = vsyncpa [#allocation3], 0  ;;  %s664_s0 = inlined_call_operand.hbm [shape: f32[16,32], index: 0, kind: input, shape index: {}]   ;;  %s665_s1 = inlined_call_operand.hbm [shape: f32[32,128], index: 1, kind: input, shape index: {}]   ;;  %s666_s2 = inlined_call_operand.hbm [shape: f32[16,128], index: 2, kind: output, shape index: {}]  }
   0x1   :  { %9 = vsyncpa [#allocation3 + $0x1], 0 }
   0x2   :  { %10 = vsyncpa [#allocation6], 0 }
   0x3   :  { %11 = vsyncpa [#allocation4], 0 }
   0x4   :  { %13 = vsyncpa [#allocation4 + $0x1], 0  ;;  %s528_s9 = smov 0   ;;  %s530_s10 = smov 0  }
   0x5   :  { %s532_s11 = smov 0   ;;  %s534_s12 = smov 0  }
   0x6 LB: > { %s108_s15 = sshll.u32 %s665_s1, 4  ;;  %s552_s16 = sadd.s32 4294967295, %s508_s12   ;;  %s508_s12 = sphi %s534_s12, %s676_s12   ;;  %s504_s11 = sphi %s532_s11, %s675_s11   ;;  %s500_s10 = sphi %s530_s10, %s674_s10   ;;  %s496_s9 = sphi %s528_s9, %s673_s9   ;;  %s109_s15 = int_to_ptr.hbm [resolvable:$true] %s108_s15 }
   0x7   : > { %p305_p0 = scmp.ge.s32.totalorder %s508_s12, 1  ;;  %p40_p1 = scmp.eq.s32.totalorder %s552_s16, 0 }
   0x8   : > { %p97_p2 = scmp.lt.s32.totalorder %s508_s12, 3  ;;  %s510_s18 = smov [#allocation5]  }
   0x9   : > { %s110_s19 = sshll.u32 %s510_s18, 4  ;;  %s511_s20 = smov 128   ;;  %s111_s19 = int_to_ptr.vmem [resolvable:$true] %s110_s19 }
   0xa   : > { %p557_p3 = pnand %p305_p0, %p97_p2  ;;  %s512_s21 = smov 8  }
   0xb   : > { %s304_s22 = sadd.s32 4294967294, %s508_s12   ;;  %s568_s23 = sadd.s32 1, %s508_s12  }
   0xc   : > { %p327_p4 = pneg %p557_p3  ;;  %s26_s24 = sadd.s32 1, %s504_s11 }
   0xd   : > { %s23_s25 = ssub.s32 %s508_s12, %s568_s23  ;;  %p33_p7 = scmp.ne.s32.totalorder %s504_s11, %s500_s10 }
   0xe   : > { %p328_p6 = pnand %p327_p4, %p40_p1  ;;  %p24_p8 = scmp.eq.s32.totalorder %s23_s25, 0 }
   0xf   : > { %p34_p9 = scmp.eq.s32.totalorder %s508_s12, 0  ;;  %p39_p10 = scmp.ne.s32.totalorder %s500_s10, %s496_s9 }
  0x10   : > { %330 = dma.hbm_to_vmem [thread:$0]  (!%p328_p6), %s109_s15, 512, %s111_s19, [#allocation6], %s511_s20, %s511_s20, %s512_s21  }
  0x11   : > { %p84_p11 = scmp.eq.s32.totalorder %s552_s16, 1  ;;  %p584_p12 = por %p40_p1, %p39_p10 }
  0x12   : > { %s580_s26 = scalar_select %p24_p8, %s504_s11, %s26_s24  }
  0x13   : > { %p588_p13 = por %p84_p11, %p33_p7  ;;  %p90_p0 = scmp.eq.s32.totalorder %s304_s22, 1 }
  0x14   : > { %p35_p2 = por %p34_p9, %p33_p7  ;;  %s124_s29 = sand.u32 1, %s504_s11  }
  0x15   : > { %p593_p4 = por %p90_p0, %p39_p10  ;;  %p340_p6 = scmp.lt.s32.totalorder %s508_s12, 2 }
  0x16   : > { %s308_s3 = sshll.u32 %s124_s29, 3  ;;  %s309_s4 = sshll.u32 %s508_s12, 3 }
  0x17   : > { %s132_s7 = scalar_lea.hbm %s664_s0, %s309_s4  ;;  %s128_s13 = scalar_lea.vmem [#allocation2], %s308_s3 }
  0x18   : > { %s134_s8 = sshll.u32 %s132_s7, 4  ;;  %s136_s14 = sshll.u32 %s128_s13, 4  ;;  %s135_s8 = int_to_ptr.hbm [resolvable:$true] %s134_s8  ;;  %s137_s14 = int_to_ptr.vmem [resolvable:$true] %s136_s14 }
  0x19   : > { %p602_p8 = pnand %p340_p6, %p35_p2  ;;  %s125_s18 = scalar_lea.sflag [#allocation3], %s124_s29 }
  0x1a   : > { %s408_s19 = sshra.s32 %s135_s8, 4  ;;  %s415_s24 = scalar_lea.hbm %s664_s0, 16  ;;  %s409_s19 = int_to_ptr.hbm [resolvable:$true] %s408_s19 }
  0x1b   : > { %s410_s20 = scalar_lea.hbm %s409_s19, 8  ;;  %p412_p9 = pneg %p602_p8 }
  0x1c   : > { %p411_p7 = scmp.ne.s32.totalorder %s409_s19, %s410_s20  ;;  %p416_p0 = scmp.lt.s32.totalorder %s409_s19, %s664_s0 }
  0x1d   : > { %p417_p2 = scmp.lt.s32.totalorder %s415_s24, %s410_s20 }
  0x1e   : > { %p413_p10 = pnand %p412_p9, %p411_p7 }
  0x1f   : > { %p418_p6 = por %p417_p2, %p416_p0 }
  0x20   : > { %p414_p11 = pneg %p413_p10 }
  0x22   : > { %p419_p5 = pnand %p418_p6, %p414_p11 }
  0x24   : > { %422 = shalt.err (!%p419_p5)
}
  0x25   : > { %334 = dma.hbm_to_vmem [thread:$0]  (!%p602_p8), %s135_s8, 128, %s137_s14, %s125_s18  }
  0x26   : > { %145 = sbr.rel (%p557_p3) target bundleno = 183 (0xb7), region = 28  ;;  %s619_s29 = sand.u32 (!%p557_p3), 1, %s500_s10  }
  0x27   : > { %s311_s4 = sshll.u32 (!%p557_p3), %s619_s29, 3  ;;  %s148_s5 = scalar_lea.sflag (!%p557_p3), [#allocation3], %s619_s29 }
  0x28   : > { %s151_s6 = scalar_lea.vmem (!%p557_p3), [#allocation2], %s311_s4 }
  0x2b   : > { %483 = dma.done.wait (%p584_p12), %s148_s5, 128  }
  0x2c   : > { %485 = vsyncadd (%p584_p12), %s148_s5, 4294967168 }
  0x2d   : > { %487 = dma.done.wait (%p40_p1), [#allocation6], 512  }
  0x2e   : > { %489 = vsyncadd (%p40_p1), [#allocation6], 4294966784  ;;  %v182_v0 = vld [vmem:[#allocation5 + $0x18] sm:$0xff]  ;;  %v181_v1 = vld [vmem:[#allocation5 + $0x10] sm:$0xff]  ;;  %vm183_vm0 = vcmask 261120   ;;  %s316_s17 = sshll.u32 %s552_s16, 3 }
  0x2f   : > { %199 = vmatpush.msra.mxu0 %v182_v0  ;;  %v180_v2 = vld [vmem:[#allocation5 + $0x8] sm:$0xff]  ;;  %v179_v3 = vld [vmem:[#allocation5] sm:$0xff]  ;;  %v178_v4 = vld [vmem:[%s151_s6] sm:$0xff]  ;;  %s219_s8 = scalar_lea.hbm %s666_s2, %s316_s17  ;;  %s177_s13 = scalar_lea.vmem [#allocation7], %s311_s4 }
  0x30   : > { %s221_s14 = sshll.u32 %s177_s13, 4  ;;  %s223_s15 = sshll.u32 %s219_s8, 4  ;;  %s222_s14 = int_to_ptr.vmem [resolvable:$true] %s221_s14  ;;  %s224_s15 = int_to_ptr.hbm [resolvable:$true] %s223_s15 }
  0x31   : > { %200 = vmatpush.msra.mxu0 %v181_v1  ;;  %s209_s18 = scalar_lea.sflag [#allocation4], %s619_s29  ;;  %s452_s19 = sshra.s32 %s224_s15, 4  ;;  %s453_s19 = int_to_ptr.hbm [resolvable:$true] %s452_s19 }
  0x32   : > { %s454_s20 = scalar_lea.hbm %s453_s19, 8  ;;  %s458_s22 = scalar_lea.hbm %s666_s2, 16 }
  0x33   : > { %201 = vmatpush.msra.mxu0 %v180_v2  ;;  %p455_p1 = scmp.ne.s32.totalorder %s453_s19, %s454_s20  ;;  %p459_p12 = scmp.lt.s32.totalorder %s453_s19, %s666_s2 }
  0x34   : > { %p460_p8 = scmp.lt.s32.totalorder %s458_s22, %s454_s20 }
  0x35   : > { %202 = vmatpush.msra.mxu0 %v179_v3  ;;  %p456_p3 = pnand %p455_p1, %p588_p13 }
  0x36   : > { %314 = vmatmul.msk.f32.vlgmr.msra.gmra.mxu0 %vm183_vm0, %v178_v4  ;;  %p461_p7 = por %p460_p8, %p459_p12 }
  0x37   : > { %p457_p5 = pneg %p456_p3 }
  0x39   : > { %p462_p9 = pnand %p461_p7, %p457_p5 }
  0xb3   : > { %v204_v5 = vpop.f32.mrf.mxu0 }
  0xb4   : > { %207 = vst [vmem:[%s177_s13] sm:$0xff] %v204_v5 }
  0xb5   : > { %465 = shalt.err (!%p462_p9)
}
  0xb6   : > { %325 = dma.vmem_to_hbm [thread:$0]  (%p588_p13), %s222_s14, 128, %s224_s15, %s209_s18  }
  0xb7 PF: > { %s235_s3 = sand.u32 1, %s496_s9   ;;  %p672_p10 = scmp.ge.s32.totalorder %s508_s12, 2 }
  0xb8   : > { %s236_s29 = scalar_lea.sflag [#allocation4], %s235_s3 }
  0xb9   : > { %p336_p11 = pnand %p672_p10, %p593_p4 }
  0xbb   : > { %p337_p0 = pneg %p336_p11 }
  0xbd   : > { %491 = dma.done.wait (%p337_p0), %s236_s29, 128  }
  0xbe   : > { %493 = vsyncadd (%p337_p0), %s236_s29, 4294967168  ;;  %p16_p2 = scmp.ge.s32.totalorder %s568_s23, 4   ;;  %s673_s9 = smov %s500_s10 }
  0xbf   : > { %s674_s10 = smov %s504_s11  ;;  %s675_s11 = smov %s580_s26 }
  0xc0   : > { %s676_s12 = smov %s568_s23  ;;  %18 = sbr.rel (!%p16_p2) target bundleno = 6 (0x6), region = 77 }
  0xc5   :  { %242 = vsyncpa [#allocation3], 1 }
  0xc6   :  { %244 = vsyncpa [#allocation3 + $0x1], 1 }
  0xc7   :  { %245 = vsyncpa [#allocation6], 1 }
  0xc8   :  { %246 = vsyncpa [#allocation4], 1 }
  0xc9   :  { %248 = vsyncpa [#allocation4 + $0x1], 1 }

</bundles_post_ra>
